<compile_context>
chip_gen: v7x
topology: tpu7x:2x2x1
jax: 0.10.0
libtpu: 0.0.40
codegen_flags: <defaults>
</compile_context>

<pallas_src>
import math

import jax
import jax.numpy as jnp
from jax import lax
from jax.experimental import pallas as pl
from jax.experimental.pallas import tpu as pltpu


def _round_up(x, m):
    return -(-x // m) * m


def _tpu_caps():
    """(physical VMEM bytes per TensorCore, TensorCores per chip), with safe fallbacks."""
    kind = ""
    try:
        kind = jax.devices()[0].device_kind.lower()
    except Exception:
        pass
    is_v7 = ("v7" in kind) or ("7x" in kind)
    num_tc = 2 if is_v7 else 1                       # v7x: 2 TCs/chip; v5e/v6e: 1
    vmem_bytes = (64 << 20) if (is_v7 or not kind) else (128 << 20)
    try:
        info = pltpu.get_tpu_info()
        v = int(getattr(info, "vmem_capacity_bytes", 0) or 0)
        if v:
            vmem_bytes = v
    except Exception:
        pass
    vmem_bytes = max(32 << 20, min(vmem_bytes, 256 << 20))
    return vmem_bytes, num_tc


def _plan(B, input_dim, hidden, output_dim, x_dtype, allow_slabs):
    """Choose tile size, slab layouts and the VMEM limit for this problem/chip."""
    x_bytes = jnp.dtype(x_dtype).itemsize
    s_in = 8 * (4 // x_bytes)                        # sublane multiple: 8 (f32) / 16 (bf16)
    s_out = 8                                        # output stays f32
    pad128 = lambda d: _round_up(d, 128)

    def slab_mult(dim, sublane):
        # tm multiple required so a (tm*dim/128, 128) slab block has (sublane,128)-aligned rows.
        return (sublane * 128) // math.gcd(dim, sublane * 128)

    x_slab = allow_slabs and (input_dim % 128 != 0) and slab_mult(input_dim, s_in) <= 1024
    out_slab = allow_slabs and (output_dim % 128 != 0) and slab_mult(output_dim, s_out) <= 1024

    mult = math.lcm(s_in, s_out)
    if x_slab:
        mult = math.lcm(mult, slab_mult(input_dim, s_in))
    if out_slab:
        mult = math.lcm(mult, slab_mult(output_dim, s_out))

    vmem_phys, num_tc = _tpu_caps()
    vmem_limit = int(vmem_phys * 0.70)               # generation-aware scoped-VMEM request

    # Lane-padding-aware per-row VMEM estimate: double-buffered x/out blocks + in-kernel
    # intermediates (everything with a <128 minor dim pads to 128 lanes in VMEM/vregs).
    x_row = x_bytes * (input_dim if x_slab else pad128(input_dim))
    out_row = 4 * (output_dim if out_slab else pad128(output_dim))
    interm = 4 * pad128(hidden)                      # hidden activation h
    if x_slab:
        interm += x_bytes * pad128(input_dim)        # relayouted x operand for the MXU
    if out_slab:
        interm += 4 * pad128(output_dim)             # y before the lane-dense reshape
    row_bytes = 2 * x_row + 2 * out_row + interm

    weights_bytes = 2 * 4 * (_round_up(input_dim, 8) * pad128(hidden) + 8 * pad128(hidden)
                             + _round_up(hidden, 8) * pad128(output_dim) + 8 * pad128(output_dim))
    budget = vmem_limit - weights_bytes - (4 << 20)  # 4 MiB headroom for Mosaic scratch/sems

    tm_vmem = max(mult, budget // max(row_bytes, 1))
    tm_target = max(mult, (4 << 20) // max(x_bytes * input_dim, 1))   # ~4 MiB of x per step

    b_ceil = _round_up(max(B, 1), mult)
    tm = min(tm_vmem, tm_target, b_ceil)

    # Only on multi-TC chips (v7x): keep >= 2 steps per core so each core's pipeline can prefetch.
    if num_tc >= 2 and b_ceil >= 2 * mult:
        want_steps = min(2 * num_tc, b_ceil // mult)
        tm = min(tm, max(mult, b_ceil // want_steps))

    tm = max(mult, (tm // mult) * mult)
    b_pad = _round_up(max(B, 1), tm)
    return dict(tm=tm, b_pad=b_pad, x_slab=x_slab, out_slab=out_slab, vmem_limit=vmem_limit)


def _make_kernel(tm, input_dim, x_slab, out_slab):
    def kernel(x_ref, w1_ref, b1_ref, w2_ref, b2_ref, o_ref):
        x = x_ref[...]
        if x_slab:
            # (tm*input_dim//128, 128) row-major slab -> (tm, input_dim): pure relayout.
            x = x.reshape(tm, input_dim)
        h = jnp.dot(x, w1_ref[...], preferred_element_type=jnp.float32)
        h = jnp.maximum(h + b1_ref[...], 0.0)                        # bias + ReLU (VPU)
        y = jnp.dot(h, w2_ref[...], preferred_element_type=jnp.float32) + b2_ref[...]
        if out_slab:
            # (tm, output_dim) -> (tm*output_dim//128, 128): unmasked full-width stores.
            y = y.reshape(o_ref.shape)
        o_ref[...] = y.astype(o_ref.dtype)
    return kernel


def _forward(x, w1, b1, w2, b2, compute_dtype, allow_slabs):
    B, input_dim = x.shape
    hidden = w1.shape[1]
    output_dim = w2.shape[1]

    p = _plan(B, input_dim, hidden, output_dim, compute_dtype, allow_slabs)
    tm, b_pad = p["tm"], p["b_pad"]
    x_slab, out_slab = p["x_slab"], p["out_slab"]

    xc = x.astype(compute_dtype)
    w1c = w1.astype(compute_dtype)
    b1f = b1.astype(jnp.float32)
    w2f = w2.astype(jnp.float32)
    b2f = b2.astype(jnp.float32)

    if b_pad != B:
        xc = jnp.pad(xc, ((0, b_pad - B), (0, 0)))   # padded rows computed, then discarded

    if x_slab:
        x_in = xc.reshape((b_pad * input_dim) // 128, 128)           # free row-major reshape
        x_spec = pl.BlockSpec(((tm * input_dim) // 128, 128), lambda i: (i, 0))
    else:
        x_in = xc
        x_spec = pl.BlockSpec((tm, input_dim), lambda i: (i, 0))

    in_specs = [
        x_spec,
        pl.BlockSpec((input_dim, hidden), lambda i: (0, 0)),         # W1 resident
        pl.BlockSpec((1, hidden), lambda i: (0, 0)),                 # b1 resident
        pl.BlockSpec((hidden, output_dim), lambda i: (0, 0)),        # W2 resident
        pl.BlockSpec((1, output_dim), lambda i: (0, 0)),             # b2 resident
    ]

    if out_slab:
        out_shape = jax.ShapeDtypeStruct(((b_pad * output_dim) // 128, 128), jnp.float32)
        out_spec = pl.BlockSpec(((tm * output_dim) // 128, 128), lambda i: (i, 0))
    else:
        out_shape = jax.ShapeDtypeStruct((b_pad, output_dim), jnp.float32)
        out_spec = pl.BlockSpec((tm, output_dim), lambda i: (i, 0))

    out = pl.pallas_call(
        _make_kernel(tm, input_dim, x_slab, out_slab),
        out_shape=out_shape,
        grid_spec=pltpu.PrefetchScalarGridSpec(
            num_scalar_prefetch=0,
            grid=(b_pad // tm,),
            in_specs=in_specs,
            out_specs=out_spec,
        ),
        compiler_params=pltpu.CompilerParams(
            dimension_semantics=("parallel",),
            vmem_limit_bytes=p["vmem_limit"],
        ),
    )(x_in, w1c, b1f, w2f, b2f)

    if out_slab:
        out = out.reshape(b_pad, output_dim)
    return out[:B]


def nonlinear_mapping(x, w1, b1, w2, b2, *, compute_dtype=jnp.float32):
    """Forward pass of NonlinearMapping: relu(x @ w1 + b1) @ w2 + b2.

    x: (B, input_dim); w1: (input_dim, 16); b1: (1, 16); w2: (16, output_dim); b2: (1, output_dim).
    Returns (B, output_dim) float32.
    """
    try:
        return _forward(x, w1, b1, w2, b2, compute_dtype, allow_slabs=True)
    except Exception:
        # The lane-dense slab layouts need an in-kernel value reshape; if the toolchain rejects
        # that relayout, retry with the plain (lane-sparse, always-supported) layout.
        return _forward(x, w1, b1, w2, b2, compute_dtype, allow_slabs=False)


def init_params(key, input_dim, output_dim, hidden=16):
    """Deterministic init mirroring PyTorch nn.Linear default (uniform +-1/sqrt(fan_in))."""
    k1, k2, k3, k4 = jax.random.split(key, 4)
    lim1 = 1.0 / jnp.sqrt(jnp.float32(input_dim))
    lim2 = 1.0 / jnp.sqrt(jnp.float32(hidden))
    w1 = jax.random.uniform(k1, (input_dim, hidden), jnp.float32, -lim1, lim1)
    b1 = jax.random.uniform(k2, (1, hidden), jnp.float32, -lim1, lim1)
    w2 = jax.random.uniform(k3, (hidden, output_dim), jnp.float32, -lim2, lim2)
    b2 = jax.random.uniform(k4, (1, output_dim), jnp.float32, -lim2, lim2)
    return w1, b1, w2, b2


if __name__ == "__main__":
    key = jax.random.PRNGKey(0)
    kx, kp, kx2 = jax.random.split(key, 3)

    input_dim, output_dim = 32, 8
    w1, b1, w2, b2 = init_params(kp, input_dim, output_dim)

    def ref_fn(xv):
        h = jnp.maximum(jnp.dot(xv, w1, precision=lax.Precision.HIGHEST) + b1, 0.0)
        return jnp.dot(h, w2, precision=lax.Precision.HIGHEST) + b2

    # Case 1: batch that tiles cleanly (exercises the lane-dense x and out slab paths).
    x = jax.random.normal(kx, (256, input_dim), jnp.float32)
    out = jax.block_until_ready(nonlinear_mapping(x, w1, b1, w2, b2))
    ref = ref_fn(x)
    assert out.shape == ref.shape
    assert jnp.allclose(out, ref, atol=1e-3, rtol=1e-3)

    # Case 2: ragged batch (zero-padded up to the tile multiple, padding discarded).
    x2 = jax.random.normal(kx2, (50, input_dim), jnp.float32)
    out2 = jax.block_until_ready(nonlinear_mapping(x2, w1, b1, w2, b2))
    ref2 = ref_fn(x2)
    assert out2.shape == ref2.shape
    assert jnp.allclose(out2, ref2, atol=1e-3, rtol=1e-3)

    # Case 3: bf16 x/W1 path (halves dominant HBM read traffic), f32 accumulation.
    out3 = jax.block_until_ready(
        nonlinear_mapping(x, w1, b1, w2, b2, compute_dtype=jnp.bfloat16))
    assert out3.shape == ref.shape
    assert jnp.allclose(out3, ref, atol=5e-2, rtol=5e-2)

    print("KERNEL_OK")
</pallas_src>

<mosaic_0001>
module attributes {stable_mosaic.version = 11 : i64} {
  func.func @kernel(%arg0: i32, %arg1: memref<64x128xf32, #tpu.memory_space<vmem>>, %arg2: memref<32x16xf32, #tpu.memory_space<vmem>>, %arg3: memref<1x16xf32, #tpu.memory_space<vmem>>, %arg4: memref<16x8xf32, #tpu.memory_space<vmem>>, %arg5: memref<1x8xf32, #tpu.memory_space<vmem>>, %arg6: memref<16x128xf32, #tpu.memory_space<vmem>>) attributes {dimension_semantics = [#tpu.dimension_semantics<parallel>], iteration_bounds = array<i64: 1>, scalar_prefetch = 0 : i64, scratch_operands = 0 : i64, tpu.core_type = #tpu.core_type<tc>, window_params = [{transform_indices = @transform_0, window_bounds = array<i64: 64, 128>}, {pipeline_mode = #tpu.pipeline_mode<synchronous>, transform_indices = @transform_1, window_bounds = array<i64: 32, 16>}, {pipeline_mode = #tpu.pipeline_mode<synchronous>, transform_indices = @transform_2, window_bounds = array<i64: 1, 16>}, {pipeline_mode = #tpu.pipeline_mode<synchronous>, transform_indices = @transform_3, window_bounds = array<i64: 16, 8>}, {pipeline_mode = #tpu.pipeline_mode<synchronous>, transform_indices = @transform_4, window_bounds = array<i64: 1, 8>}, {transform_indices = @transform_5, window_bounds = array<i64: 16, 128>}]} {
    %c0 = arith.constant 0 : index
    %c0_0 = arith.constant 0 : index
    %0 = vector.load %arg1[%c0, %c0_0] : memref<64x128xf32, #tpu.memory_space<vmem>>, vector<64x128xf32>
    %1 = vector.shape_cast %0 : vector<64x128xf32> to vector<256x32xf32>
    %c0_1 = arith.constant 0 : index
    %c0_2 = arith.constant 0 : index
    %2 = vector.load %arg2[%c0_1, %c0_2] : memref<32x16xf32, #tpu.memory_space<vmem>>, vector<32x16xf32>
    %cst = arith.constant dense<0.000000e+00> : vector<256x16xf32>
    %3 = tpu.matmul %1, %2, %cst {dimension_numbers = #tpu.dot_dimension_numbers<[1], [0], [0], [1], [0, 0, 1, 1], [], []>} : vector<256x32xf32>, vector<32x16xf32>, vector<256x16xf32> -> vector<256x16xf32>
    %c0_3 = arith.constant 0 : index
    %c0_4 = arith.constant 0 : index
    %4 = vector.load %arg3[%c0_3, %c0_4] : memref<1x16xf32, #tpu.memory_space<vmem>>, vector<1x16xf32>
    %5 = vector.broadcast %4 : vector<1x16xf32> to vector<256x16xf32>
    %6 = arith.addf %3, %5 : vector<256x16xf32>
    %cst_5 = arith.constant 0.000000e+00 : f32
    %7 = vector.broadcast %cst_5 : f32 to vector<256x16xf32>
    %8 = arith.maximumf %6, %7 : vector<256x16xf32>
    %c0_6 = arith.constant 0 : index
    %c0_7 = arith.constant 0 : index
    %9 = vector.load %arg4[%c0_6, %c0_7] : memref<16x8xf32, #tpu.memory_space<vmem>>, vector<16x8xf32>
    %cst_8 = arith.constant dense<0.000000e+00> : vector<256x8xf32>
    %10 = tpu.matmul %8, %9, %cst_8 {dimension_numbers = #tpu.dot_dimension_numbers<[1], [0], [0], [1], [0, 0, 1, 1], [], []>} : vector<256x16xf32>, vector<16x8xf32>, vector<256x8xf32> -> vector<256x8xf32>
    %c0_9 = arith.constant 0 : index
    %c0_10 = arith.constant 0 : index
    %11 = vector.load %arg5[%c0_9, %c0_10] : memref<1x8xf32, #tpu.memory_space<vmem>>, vector<1x8xf32>
    %12 = vector.broadcast %11 : vector<1x8xf32> to vector<256x8xf32>
    %13 = arith.addf %10, %12 : vector<256x8xf32>
    %14 = vector.shape_cast %13 : vector<256x8xf32> to vector<16x128xf32>
    %c0_11 = arith.constant 0 : index
    %c0_12 = arith.constant 0 : index
    %15 = vector.load %arg6[%c0_11, %c0_12] : memref<16x128xf32, #tpu.memory_space<vmem>>, vector<16x128xf32>
    tpu.vector_store %arg6[%c0_11, %c0_12], %14 {strides = array<i32>} : memref<16x128xf32, #tpu.memory_space<vmem>>, vector<16x128xf32>,
    return
  }
  func.func @transform_0(%arg0: i32) -> (i32, i32) {
    %c0_i32 = arith.constant 0 : i32
    %c0_i32_0 = arith.constant 0 : i32
    return %arg0, %c0_i32 : i32, i32
  }
  func.func @transform_1(%arg0: i32) -> (i32, i32) {
    %c0_i32 = arith.constant 0 : i32
    %c0_i32_0 = arith.constant 0 : i32
    %c0_i32_1 = arith.constant 0 : i32
    return %c0_i32, %c0_i32_0 : i32, i32
  }
  func.func @transform_2(%arg0: i32) -> (i32, i32) {
    %c0_i32 = arith.constant 0 : i32
    %c0_i32_0 = arith.constant 0 : i32
    %c0_i32_1 = arith.constant 0 : i32
    return %c0_i32, %c0_i32_0 : i32, i32
  }
  func.func @transform_3(%arg0: i32) -> (i32, i32) {
    %c0_i32 = arith.constant 0 : i32
    %c0_i32_0 = arith.constant 0 : i32
    %c0_i32_1 = arith.constant 0 : i32
    return %c0_i32, %c0_i32_0 : i32, i32
  }
  func.func @transform_4(%arg0: i32) -> (i32, i32) {
    %c0_i32 = arith.constant 0 : i32
    %c0_i32_0 = arith.constant 0 : i32
    %c0_i32_1 = arith.constant 0 : i32
    return %c0_i32, %c0_i32_0 : i32, i32
  }
  func.func @transform_5(%arg0: i32) -> (i32, i32) {
    %c0_i32 = arith.constant 0 : i32
    %c0_i32_0 = arith.constant 0 : i32
    return %arg0, %c0_i32 : i32, i32
  }
}

module attributes {stable_mosaic.version = 11 : i64} {
  func.func @kernel(%arg0: i32, %arg1: memref<256x32xf32, #tpu.memory_space<vmem>>, %arg2: memref<32x16xf32, #tpu.memory_space<vmem>>, %arg3: memref<1x16xf32, #tpu.memory_space<vmem>>, %arg4: memref<16x8xf32, #tpu.memory_space<vmem>>, %arg5: memref<1x8xf32, #tpu.memory_space<vmem>>, %arg6: memref<256x8xf32, #tpu.memory_space<vmem>>) attributes {dimension_semantics = [#tpu.dimension_semantics<parallel>], iteration_bounds = array<i64: 1>, scalar_prefetch = 0 : i64, scratch_operands = 0 : i64, tpu.core_type = #tpu.core_type<tc>, window_params = [{transform_indices = @transform_0, window_bounds = array<i64: 256, 32>}, {pipeline_mode = #tpu.pipeline_mode<synchronous>, transform_indices = @transform_1, window_bounds = array<i64: 32, 16>}, {pipeline_mode = #tpu.pipeline_mode<synchronous>, transform_indices = @transform_2, window_bounds = array<i64: 1, 16>}, {pipeline_mode = #tpu.pipeline_mode<synchronous>, transform_indices = @transform_3, window_bounds = array<i64: 16, 8>}, {pipeline_mode = #tpu.pipeline_mode<synchronous>, transform_indices = @transform_4, window_bounds = array<i64: 1, 8>}, {transform_indices = @transform_5, window_bounds = array<i64: 256, 8>}]} {
    %c0 = arith.constant 0 : index
    %c0_0 = arith.constant 0 : index
    %0 = vector.load %arg1[%c0, %c0_0] : memref<256x32xf32, #tpu.memory_space<vmem>>, vector<256x32xf32>
    %c0_1 = arith.constant 0 : index
    %c0_2 = arith.constant 0 : index
    %1 = vector.load %arg2[%c0_1, %c0_2] : memref<32x16xf32, #tpu.memory_space<vmem>>, vector<32x16xf32>
    %cst = arith.constant dense<0.000000e+00> : vector<256x16xf32>
    %2 = tpu.matmul %0, %1, %cst {dimension_numbers = #tpu.dot_dimension_numbers<[1], [0], [0], [1], [0, 0, 1, 1], [], []>} : vector<256x32xf32>, vector<32x16xf32>, vector<256x16xf32> -> vector<256x16xf32>
    %c0_3 = arith.constant 0 : index
    %c0_4 = arith.constant 0 : index
    %3 = vector.load %arg3[%c0_3, %c0_4] : memref<1x16xf32, #tpu.memory_space<vmem>>, vector<1x16xf32>
    %4 = vector.broadcast %3 : vector<1x16xf32> to vector<256x16xf32>
    %5 = arith.addf %2, %4 : vector<256x16xf32>
    %cst_5 = arith.constant 0.000000e+00 : f32
    %6 = vector.broadcast %cst_5 : f32 to vector<256x16xf32>
    %7 = arith.maximumf %5, %6 : vector<256x16xf32>
    %c0_6 = arith.constant 0 : index
    %c0_7 = arith.constant 0 : index
    %8 = vector.load %arg4[%c0_6, %c0_7] : memref<16x8xf32, #tpu.memory_space<vmem>>, vector<16x8xf32>
    %cst_8 = arith.constant dense<0.000000e+00> : vector<256x8xf32>
    %9 = tpu.matmul %7, %8, %cst_8 {dimension_numbers = #tpu.dot_dimension_numbers<[1], [0], [0], [1], [0, 0, 1, 1], [], []>} : vector<256x16xf32>, vector<16x8xf32>, vector<256x8xf32> -> vector<256x8xf32>
    %c0_9 = arith.constant 0 : index
    %c0_10 = arith.constant 0 : index
    %10 = vector.load %arg5[%c0_9, %c0_10] : memref<1x8xf32, #tpu.memory_space<vmem>>, vector<1x8xf32>
    %11 = vector.broadcast %10 : vector<1x8xf32> to vector<256x8xf32>
    %12 = arith.addf %9, %11 : vector<256x8xf32>
    %c0_11 = arith.constant 0 : index
    %c0_12 = arith.constant 0 : index
    %13 = vector.load %arg6[%c0_11, %c0_12] : memref<256x8xf32, #tpu.memory_space<vmem>>, vector<256x8xf32>
    tpu.vector_store %arg6[%c0_11, %c0_12], %12 {strides = array<i32>} : memref<256x8xf32, #tpu.memory_space<vmem>>, vector<256x8xf32>,
    return
  }
  func.func @transform_0(%arg0: i32) -> (i32, i32) {
    %c0_i32 = arith.constant 0 : i32
    %c0_i32_0 = arith.constant 0 : i32
    return %arg0, %c0_i32 : i32, i32
  }
  func.func @transform_1(%arg0: i32) -> (i32, i32) {
    %c0_i32 = arith.constant 0 : i32
    %c0_i32_0 = arith.constant 0 : i32
    %c0_i32_1 = arith.constant 0 : i32
    return %c0_i32, %c0_i32_0 : i32, i32
  }
  func.func @transform_2(%arg0: i32) -> (i32, i32) {
    %c0_i32 = arith.constant 0 : i32
    %c0_i32_0 = arith.constant 0 : i32
    %c0_i32_1 = arith.constant 0 : i32
    return %c0_i32, %c0_i32_0 : i32, i32
  }
  func.func @transform_3(%arg0: i32) -> (i32, i32) {
    %c0_i32 = arith.constant 0 : i32
    %c0_i32_0 = arith.constant 0 : i32
    %c0_i32_1 = arith.constant 0 : i32
    return %c0_i32, %c0_i32_0 : i32, i32
  }
  func.func @transform_4(%arg0: i32) -> (i32, i32) {
    %c0_i32 = arith.constant 0 : i32
    %c0_i32_0 = arith.constant 0 : i32
    %c0_i32_1 = arith.constant 0 : i32
    return %c0_i32, %c0_i32_0 : i32, i32
  }
  func.func @transform_5(%arg0: i32) -> (i32, i32) {
    %c0_i32 = arith.constant 0 : i32
    %c0_i32_0 = arith.constant 0 : i32
    return %arg0, %c0_i32 : i32, i32
  }
}

</mosaic_0001>

<bundles_post_ra>
// kernel: tpu_custom_call.1
= control target key start
LH: loop header
LB: loop body
LE: loop exit
PB: predicated region body
PF: predicated region fallthrough
CT: control target
= control target key end

     0   :  { %10 = vsyncpa [#allocation3], 0  ;;  %s1562_s0 = inlined_call_operand.hbm [shape: f32[256,32], index: 0, kind: input, shape index: {}]   ;;  %s1563_s1 = inlined_call_operand.hbm [shape: f32[32,16], index: 1, kind: input, shape index: {}]   ;;  %s1564_s2 = inlined_call_operand.hbm [shape: f32[1,16], index: 2, kind: input, shape index: {}]   ;;  %s1565_s3 = inlined_call_operand.hbm [shape: f32[16,8], index: 3, kind: input, shape index: {}]   ;;  %s1566_s4 = inlined_call_operand.hbm [shape: f32[1,8], index: 4, kind: input, shape index: {}]   ;;  %s1567_s5 = inlined_call_operand.hbm [shape: f32[256,8], index: 5, kind: output, shape index: {}]  }
   0x1   :  { %11 = vsyncpa [#allocation6], 0 }
   0x2   :  { %12 = vsyncpa [#allocation9], 0 }
   0x3   :  { %13 = vsyncpa [#allocation4], 0  ;;  %s1269_s18 = smov [#allocation5]   ;;  %s1270_s20 = smov [#allocation8]  }
   0x4   :  { %s31_s19 = sshll.u32 %s1269_s18, 4  ;;  %s53_s21 = sshll.u32 %s1270_s20, 4  ;;  %s32_s19 = int_to_ptr.vmem [resolvable:$true] %s31_s19  ;;  %s1307_s21 = int_to_ptr.vmem [resolvable:$true] %s53_s21 }
   0x5   :  { %s1129_s24 = scalar_lea.hbm %s1563_s1, 512 }
   0x6   :  { %p1130_p0 = scmp.ne.s32.totalorder %s1563_s1, %s1129_s24  ;;  %p1133_p1 = scmp.lt.u32.totalorder %s1129_s24, %s1563_s1 }
   0x8   :  { %p1135_p2 = pnand %p1133_p1, %p1130_p0 }
   0xa   :  { %1138 = shalt.err (!%p1135_p2)
}
   0xb   :  { %s1139_s29 = scalar_lea.vmem %s32_s19, 512  ;;  %p1144_p4 = scmp.lt.s32.totalorder %s32_s19, %s32_s19 }
   0xc   :  { %p1140_p3 = scmp.ne.s32.totalorder %s32_s19, %s1139_s29  ;;  %p1145_p5 = scmp.lt.s32.totalorder %s1139_s29, %s1139_s29 }
   0xe   :  { %p1146_p6 = por %p1145_p5, %p1144_p4 }
  0x10   :  { %p1147_p7 = pnand %p1146_p6, %p1140_p3 }
  0x12   :  { %1150 = shalt.err (!%p1147_p7)
}
  0x13   :  { %s1271_s30 = smov 128   ;;  %s1272_s6 = smov 8  }
  0x14   :  { %37 = dma.hbm_to_vmem [thread:$0]  %s1563_s1, 512, %s32_s19, [#allocation6], %s1271_s30, %s1271_s30, %s1272_s6  }
  0x15   :  { %s1151_s11 = scalar_lea.hbm %s1565_s3, 256 }
  0x16   :  { %p1152_p8 = scmp.ne.s32.totalorder %s1565_s3, %s1151_s11  ;;  %p1155_p9 = scmp.lt.u32.totalorder %s1151_s11, %s1565_s3 }
  0x18   :  { %p1157_p10 = pnand %p1155_p9, %p1152_p8 }
  0x1a   :  { %1160 = shalt.err (!%p1157_p10)
}
  0x1b   :  { %s1161_s16 = scalar_lea.vmem %s1307_s21, 256  ;;  %p1166_p12 = scmp.lt.s32.totalorder %s1307_s21, %s1307_s21 }
  0x1c   :  { %p1162_p11 = scmp.ne.s32.totalorder %s1307_s21, %s1161_s16  ;;  %p1167_p13 = scmp.lt.s32.totalorder %s1161_s16, %s1161_s16 }
  0x1e   :  { %p1168_p0 = por %p1167_p13, %p1166_p12 }
  0x20   :  { %p1169_p1 = pnand %p1168_p0, %p1162_p11 }
  0x22   :  { %1172 = shalt.err (!%p1169_p1)
}
  0x23   :  { %59 = dma.hbm_to_vmem [thread:$0]  %s1565_s3, 256, %s1307_s21, [#allocation9], %s1271_s30, %s1271_s30, %s1272_s6  }
  0x24   :  { %s1273_s18 = smov [#allocation2]   ;;  %s1274_s20 = smov [#allocation7]  }
  0x25   :  { %s19_s19 = sshll.u32 %s1273_s18, 4  ;;  %s44_s22 = sshll.u32 %s1274_s20, 4  ;;  %s20_s19 = int_to_ptr.vmem [resolvable:$true] %s19_s19  ;;  %s45_s22 = int_to_ptr.vmem [resolvable:$true] %s44_s22 }
  0x26   :  { %s1173_s25 = scalar_lea.hbm %s1562_s0, 4096 }
  0x27   :  { %p1174_p2 = scmp.ne.s32.totalorder %s1562_s0, %s1173_s25  ;;  %p1177_p3 = scmp.lt.u32.totalorder %s1173_s25, %s1562_s0 }
  0x29   :  { %p1179_p4 = pnand %p1177_p3, %p1174_p2 }
  0x2b   :  { %1182 = shalt.err (!%p1179_p4)
}
  0x2c   :  { %s1183_s3 = scalar_lea.vmem %s20_s19, 4096  ;;  %p1188_p6 = scmp.lt.s32.totalorder %s20_s19, %s20_s19 }
  0x2d   :  { %p1184_p5 = scmp.ne.s32.totalorder %s20_s19, %s1183_s3  ;;  %p1189_p7 = scmp.lt.s32.totalorder %s1183_s3, %s1183_s3 }
  0x2f   :  { %p1190_p8 = por %p1189_p7, %p1188_p6 }
  0x31   :  { %p1191_p9 = pnand %p1190_p8, %p1184_p5 }
  0x33   :  { %1194 = shalt.err (!%p1191_p9)
}
  0x34   :  { %25 = dma.hbm_to_vmem [thread:$0]  %s1562_s0, 4096, %s20_s19, [#allocation3], %s1271_s30, %s1271_s30, %s1272_s6  }
  0x35   :  { %s1195_s10 = scalar_lea.hbm %s1564_s2, 16 }
  0x36   :  { %p1196_p10 = scmp.ne.s32.totalorder %s1564_s2, %s1195_s10  ;;  %p1199_p11 = scmp.lt.u32.totalorder %s1195_s10, %s1564_s2 }
  0x38   :  { %p1201_p12 = pnand %p1199_p11, %p1196_p10 }
  0x3a   :  { %1204 = shalt.err (!%p1201_p12)
}
  0x3b   :  { %s1205_s15 = scalar_lea.vmem %s45_s22, 16  ;;  %s1209_s16 = scalar_lea.vmem %s45_s22, 32 }
  0x3c   :  { %p1206_p13 = scmp.ne.s32.totalorder %s45_s22, %s1205_s15  ;;  %p1210_p0 = scmp.lt.s32.totalorder %s45_s22, %s45_s22 }
  0x3d   :  { %p1211_p1 = scmp.lt.s32.totalorder %s1209_s16, %s1205_s15 }
  0x3f   :  { %p1212_p2 = por %p1211_p1, %p1210_p0 }
  0x41   :  { %p1213_p3 = pnand %p1212_p2, %p1206_p13 }
  0x43   :  { %1216 = shalt.err (!%p1213_p3)
}
  0x44   :  { %47 = dma.hbm_to_vmem [thread:$0]  %s1564_s2, 16, %s45_s22, [#allocation6]  }
  0x45   :  { %s1275_s17 = smov [#allocation10]   ;;  %s1217_s23 = scalar_lea.hbm %s1566_s4, 16 }
  0x46   :  { %s66_s18 = sshll.u32 %s1275_s17, 4  ;;  %p1218_p4 = scmp.ne.s32.totalorder %s1566_s4, %s1217_s23  ;;  %s67_s18 = int_to_ptr.vmem [resolvable:$true] %s66_s18 }
  0x47   :  { %p1221_p5 = scmp.lt.u32.totalorder %s1217_s23, %s1566_s4 }
  0x49   :  { %p1223_p6 = pnand %p1221_p5, %p1218_p4 }
  0x4b   :  { %1226 = shalt.err (!%p1223_p6)
}
  0x4c   :  { %s1227_s28 = scalar_lea.vmem %s67_s18, 16  ;;  %s1231_s2 = scalar_lea.vmem %s67_s18, 32 }
  0x4d   :  { %p1228_p7 = scmp.ne.s32.totalorder %s67_s18, %s1227_s28  ;;  %p1232_p8 = scmp.lt.s32.totalorder %s67_s18, %s67_s18 }
  0x4e   :  { %p1233_p9 = scmp.lt.s32.totalorder %s1231_s2, %s1227_s28 }
  0x50   :  { %p1234_p10 = por %p1233_p9, %p1232_p8 }
  0x52   :  { %p1235_p11 = pnand %p1234_p10, %p1228_p7 }
  0x54   :  { %1238 = shalt.err (!%p1235_p11)
}
  0x55   :  { %69 = dma.hbm_to_vmem [thread:$0]  %s1566_s4, 16, %s67_s18, [#allocation9]  }
  0x56   :  { %1261 = dma.done.wait [#allocation3], 4096  }
  0x57   :  { %1262 = vsyncadd [#allocation3], 4294963200 }
  0x58   :  { %1263 = dma.done.wait [#allocation6], 528  }
  0x59   :  { %1264 = vsyncadd [#allocation6], 4294966768 }
  0x5a   :  { %1265 = dma.done.wait [#allocation9], 272  }
  0x5b   :  { %1266 = vsyncadd [#allocation9], 4294967024  ;;  %vm128_vm0 = vcmask 261120   ;;  %v117_v0 = vld [vmem:[#allocation5] sm:$0xff]  ;;  %v118_v1 = vld [vmem:[#allocation5 + $0x8] sm:$0xff]  ;;  %vm491_vm1 = vcmask 130048  }
  0x5c   :  { %v119_v2 = vld [vmem:[#allocation5 + $0x10] sm:$0xff]  ;;  %v1109_v3 = vpack.c.bf16 %v118_v1, %v117_v0  ;;  %v120_v4 = vld [vmem:[#allocation5 + $0x18] sm:$0xff]  ;;  %v85_v5 = vld [vmem:[#allocation2] sm:$0xff]  ;;  %vm813_vm2 = vcmask 64512   ;;  %s1276_s4 = smov [#allocation11]  }
  0x5d   :  { %v1113_v6 = vpack.c.bf16 %v120_v4, %v119_v2  ;;  %1009 = vmatprep.mubr.msk.f32.mxu0 %vm128_vm0, %v85_v5  ;;  %v86_v7 = vld [vmem:[#allocation2 + $0x8] sm:$0xff]  ;;  %v87_v8 = vld [vmem:[#allocation2 + $0x10] sm:$0xff]  ;;  %v88_v9 = vld [vmem:[#allocation2 + $0x18] sm:$0xff]  ;;  %s851_s3 = sshll.u32 %s1276_s4, 4  ;;  %s852_s3 = int_to_ptr.vmem [resolvable:$true] %s851_s3 }
  0x5e   :  { %1110 = vmatprep.subr.bf16.mxu0 %v1109_v3  ;;  %v89_v10 = vld [vmem:[#allocation2 + $0x20] sm:$0xff]  ;;  %v90_v11 = vld [vmem:[#allocation2 + $0x28] sm:$0xff]  ;;  %v91_v12 = vld [vmem:[#allocation2 + $0x30] sm:$0xff]  ;;  %s1239_s21 = scalar_lea.vmem %s852_s3, 4096  ;;  %p1244_p13 = scmp.lt.s32.totalorder %s852_s3, %s852_s3 }
  0x5f   :  { %1112 = vmatpush3.bf16.msra.mxu0 %v1109_v3  ;;  %v92_v13 = vld [vmem:[#allocation2 + $0x38] sm:$0xff]  ;;  %v93_v14 = vld [vmem:[#allocation2 + $0x40] sm:$0xff]  ;;  %v94_v15 = vld [vmem:[#allocation2 + $0x48] sm:$0xff]  ;;  %p1240_p12 = scmp.ne.s32.totalorder %s852_s3, %s1239_s21  ;;  %p1245_p0 = scmp.lt.s32.totalorder %s1239_s21, %s1239_s21 }
  0x60   :  { %1114 = vmatprep.subr.bf16.mxu0 %v1113_v6  ;;  %v95_v16 = vld [vmem:[#allocation2 + $0x50] sm:$0xff]  ;;  %v96_v17 = vld [vmem:[#allocation2 + $0x58] sm:$0xff]  ;;  %v97_v18 = vld [vmem:[#allocation2 + $0x60] sm:$0xff] }
  0x61   :  { %v98_v19 = vld [vmem:[#allocation2 + $0x68] sm:$0xff]  ;;  %v99_v20 = vld [vmem:[#allocation2 + $0x70] sm:$0xff]  ;;  %v100_v21 = vld [vmem:[#allocation2 + $0x78] sm:$0xff]  ;;  %p1246_p1 = por %p1245_p0, %p1244_p13 }
  0x62   :  { %v101_v22 = vld [vmem:[#allocation2 + $0x80] sm:$0xff]  ;;  %v102_v23 = vld [vmem:[#allocation2 + $0x88] sm:$0xff]  ;;  %v103_v24 = vld [vmem:[#allocation2 + $0x90] sm:$0xff] }
  0x63   :  { %1116 = vmatpush3.bf16.msra.mxu0 %v1113_v6  ;;  %v104_v25 = vld [vmem:[#allocation2 + $0x98] sm:$0xff]  ;;  %v105_v26 = vld [vmem:[#allocation2 + $0xa0] sm:$0xff]  ;;  %v106_v27 = vld [vmem:[#allocation2 + $0xa8] sm:$0xff]  ;;  %p1247_p2 = pnand %p1246_p1, %p1240_p12 }
  0x64   :  { %v107_v28 = vld [vmem:[#allocation2 + $0xb0] sm:$0xff]  ;;  %v108_v29 = vld [vmem:[#allocation2 + $0xb8] sm:$0xff]  ;;  %v109_v30 = vld [vmem:[#allocation2 + $0xc0] sm:$0xff] }
  0x65   :  { %v110_v31 = vld [vmem:[#allocation2 + $0xc8] sm:$0xff]  ;;  %v111_v32 = vld [vmem:[#allocation2 + $0xd0] sm:$0xff]  ;;  %v112_v33 = vld [vmem:[#allocation2 + $0xd8] sm:$0xff] }
  0x66   :  { %1010 = vmatmul.mubr.msk.f32.vlgmr.msra.gmra.mrb[0].mxu0 %vm128_vm0, %v86_v7  ;;  %v113_v34 = vld [vmem:[#allocation2 + $0xe0] sm:$0xff]  ;;  %v114_v35 = vld [vmem:[#allocation2 + $0xe8] sm:$0xff]  ;;  %v115_v36 = vld [vmem:[#allocation2 + $0xf0] sm:$0xff] }
  0x67   :  { %1012 = vmatprep.mubr.msk.f32.mxu0 %vm128_vm0, %v87_v8  ;;  %v116_v37 = vld [vmem:[#allocation2 + $0xf8] sm:$0xff]  ;;  %v482_v38 = vld [vmem:[#allocation8] sm:$0xff]  ;;  %v483_v39 = vld [vmem:[#allocation8 + $0x8] sm:$0xff] }
  0x68   :  { %v1117_v40 = vpack.c.bf16 %v483_v39, %v482_v38  ;;  %v1415_v41 = vld [vmem:[#allocation7] ss:$0 sm:$0xff] }
  0x6a   :  { %1013 = vmatmul.mubr.msk.f32.gmra.mrb[2].mxu0 %vm128_vm0, %v88_v9  ;;  %1118 = vmatprep.subr.bf16.mxu1 %v1117_v40 }
  0x6b   :  { %1015 = vmatprep.mubr.msk.f32.mxu0 %vm128_vm0, %v89_v10  ;;  %1120 = vmatpush3.bf16.msra.mxu1 %v1117_v40 }
  0x6e   :  { %1016 = vmatmul.mubr.msk.f32.gmra.mrb[4].mxu0 %vm128_vm0, %v90_v11 }
  0x6f   :  { %1018 = vmatprep.mubr.msk.f32.mxu0 %vm128_vm0, %v91_v12 }
  0x72   :  { %1019 = vmatmul.mubr.msk.f32.gmra.mrb[6].mxu0 %vm128_vm0, %v92_v13 }
  0x73   :  { %1021 = vmatprep.mubr.msk.f32.mxu0 %vm128_vm0, %v93_v14 }
  0x76   :  { %1022 = vmatmul.mubr.msk.f32.gmra.mrb[8].mxu0 %vm128_vm0, %v94_v15 }
  0x77   :  { %1024 = vmatprep.mubr.msk.f32.mxu0 %vm128_vm0, %v95_v16 }
  0x7a   :  { %1025 = vmatmul.mubr.msk.f32.gmra.mrb[10].mxu0 %vm128_vm0, %v96_v17 }
  0x7b   :  { %1027 = vmatprep.mubr.msk.f32.mxu0 %vm128_vm0, %v97_v18 }
  0x7e   :  { %1028 = vmatmul.mubr.msk.f32.gmra.mrb[12].mxu0 %vm128_vm0, %v98_v19 }
  0x7f   :  { %1030 = vmatprep.mubr.msk.f32.mxu0 %vm128_vm0, %v99_v20 }
  0x82   :  { %1031 = vmatmul.mubr.msk.f32.gmra.mrb[14].mxu0 %vm128_vm0, %v100_v21 }
  0x83   :  { %1033 = vmatprep.mubr.msk.f32.mxu0 %vm128_vm0, %v101_v22 }
  0x86   :  { %1034 = vmatmul.mubr.msk.f32.gmra.mrb[16].mxu0 %vm128_vm0, %v102_v23 }
  0x87   :  { %1036 = vmatprep.mubr.msk.f32.mxu0 %vm128_vm0, %v103_v24 }
  0x8a   :  { %1037 = vmatmul.mubr.msk.f32.gmra.mrb[18].mxu0 %vm128_vm0, %v104_v25 }
  0x8b   :  { %1039 = vmatprep.mubr.msk.f32.mxu0 %vm128_vm0, %v105_v26 }
  0x8e   :  { %1040 = vmatmul.mubr.msk.f32.gmra.mrb[20].mxu0 %vm128_vm0, %v106_v27 }
  0x8f   :  { %1042 = vmatprep.mubr.msk.f32.mxu0 %vm128_vm0, %v107_v28 }
  0x92   :  { %1043 = vmatmul.mubr.msk.f32.gmra.mrb[22].mxu0 %vm128_vm0, %v108_v29 }
  0x93   :  { %1045 = vmatprep.mubr.msk.f32.mxu0 %vm128_vm0, %v109_v30 }
  0x96   :  { %1046 = vmatmul.mubr.msk.f32.gmra.mrb[24].mxu0 %vm128_vm0, %v110_v31 }
  0x97   :  { %1048 = vmatprep.mubr.msk.f32.mxu0 %vm128_vm0, %v111_v32 }
  0x9a   :  { %1049 = vmatmul.mubr.msk.f32.gmra.mrb[26].mxu0 %vm128_vm0, %v112_v33 }
  0x9b   :  { %1051 = vmatprep.mubr.msk.f32.mxu0 %vm128_vm0, %v113_v34 }
  0x9e   :  { %1052 = vmatmul.mubr.msk.f32.gmra.mrb[28].mxu0 %vm128_vm0, %v114_v35 }
  0x9f   :  { %1054 = vmatprep.mubr.msk.f32.mxu0 %vm128_vm0, %v115_v36 }
  0xa2   :  { %1055 = vmatmul.mubr.msk.f32.gmra.mrb[30].mxu0 %vm128_vm0, %v116_v37 }
 0x139   :  { %v1011_v42 = vpop.f32.mrb[0].mxu0 }
 0x13a   :  { %v297_v43 = vadd.f32 %v1011_v42, %v1415_v41  ;;  %v291_v44 = vpop.f32.mrb[1].mxu0 }
 0x13b   :  { %v292_v45 = vadd.f32 %v1415_v41, %v291_v44 }
 0x13c   :  { %v451_v48 = vmax.f32 %v297_v43, 0.0 }
 0x13d   :  { %v450_v46 = vmax.f32 %v292_v45, 0.0  ;;  %v1014_v47 = vpop.f32.mrb[2].mxu0 }
 0x13e   :  { %v307_v49 = vadd.f32 %v1014_v47, %v1415_v41  ;;  %v301_v50 = vpop.f32.mrb[3].mxu0 }
 0x13f   :  { %v302_v51 = vadd.f32 %v1415_v41, %v301_v50  ;;  %1061 = vmatprep.mubr.msk.f32.mxu1 %vm491_vm1, %v450_v46 }
 0x140   :  { %1062 = vmatmul.mubr.msk.f32.vlgmr.msra.gmra.mrb[0].mxu1 %vm491_vm1, %v451_v48  ;;  %v453_v54 = vmax.f32 %v307_v49, 0.0 }
 0x141   :  { %v452_v52 = vmax.f32 %v302_v51, 0.0  ;;  %v1017_v53 = vpop.f32.mrb[4].mxu0 }
 0x142   :  { %v317_v55 = vadd.f32 %v1017_v53, %v1415_v41  ;;  %v311_v56 = vpop.f32.mrb[5].mxu0 }
 0x143   :  { %v312_v57 = vadd.f32 %v1415_v41, %v311_v56  ;;  %1064 = vmatprep.mubr.msk.f32.mxu1 %vm491_vm1, %v452_v52 }
 0x144   :  { %1065 = vmatmul.mubr.msk.f32.gmra.mrb[2].mxu1 %vm491_vm1, %v453_v54  ;;  %v455_v60 = vmax.f32 %v317_v55, 0.0 }
 0x145   :  { %v454_v58 = vmax.f32 %v312_v57, 0.0  ;;  %v1020_v59 = vpop.f32.mrb[6].mxu0 }
 0x146   :  { %v327_v61 = vadd.f32 %v1020_v59, %v1415_v41  ;;  %v321_v62 = vpop.f32.mrb[7].mxu0 }
 0x147   :  { %v322_v63 = vadd.f32 %v1415_v41, %v321_v62  ;;  %1067 = vmatprep.mubr.msk.f32.mxu1 %vm491_vm1, %v454_v58 }
 0x148   :  { %1068 = vmatmul.mubr.msk.f32.gmra.mrb[4].mxu1 %vm491_vm1, %v455_v60  ;;  %v457_v2 = vmax.f32 %v327_v61, 0.0 }
 0x149   :  { %v456_v0 = vmax.f32 %v322_v63, 0.0  ;;  %v1023_v1 = vpop.f32.mrb[8].mxu0 }
 0x14a   :  { %v337_v3 = vadd.f32 %v1023_v1, %v1415_v41  ;;  %v331_v4 = vpop.f32.mrb[9].mxu0 }
 0x14b   :  { %v332_v5 = vadd.f32 %v1415_v41, %v331_v4  ;;  %1070 = vmatprep.mubr.msk.f32.mxu1 %vm491_vm1, %v456_v0 }
 0x14c   :  { %1071 = vmatmul.mubr.msk.f32.gmra.mrb[6].mxu1 %vm491_vm1, %v457_v2  ;;  %v459_v8 = vmax.f32 %v337_v3, 0.0 }
 0x14d   :  { %v458_v6 = vmax.f32 %v332_v5, 0.0  ;;  %v1026_v7 = vpop.f32.mrb[10].mxu0 }
 0x14e   :  { %v347_v9 = vadd.f32 %v1026_v7, %v1415_v41  ;;  %v341_v10 = vpop.f32.mrb[11].mxu0 }
 0x14f   :  { %v342_v11 = vadd.f32 %v1415_v41, %v341_v10  ;;  %1073 = vmatprep.mubr.msk.f32.mxu1 %vm491_vm1, %v458_v6 }
 0x150   :  { %1074 = vmatmul.mubr.msk.f32.gmra.mrb[8].mxu1 %vm491_vm1, %v459_v8  ;;  %v461_v14 = vmax.f32 %v347_v9, 0.0 }
 0x151   :  { %v460_v12 = vmax.f32 %v342_v11, 0.0  ;;  %v1029_v13 = vpop.f32.mrb[12].mxu0  ;;  %v1481_v11 = vld [vmem:[#allocation10] ss:$0 sm:$0xff] }
 0x152   :  { %v357_v15 = vadd.f32 %v1029_v13, %v1415_v41  ;;  %v351_v16 = vpop.f32.mrb[13].mxu0 }
 0x153   :  { %v352_v17 = vadd.f32 %v1415_v41, %v351_v16  ;;  %1076 = vmatprep.mubr.msk.f32.mxu1 %vm491_vm1, %v460_v12 }
 0x154   :  { %1077 = vmatmul.mubr.msk.f32.gmra.mrb[10].mxu1 %vm491_vm1, %v461_v14  ;;  %v463_v20 = vmax.f32 %v357_v15, 0.0 }
 0x155   :  { %v462_v18 = vmax.f32 %v352_v17, 0.0  ;;  %v1032_v19 = vpop.f32.mrb[14].mxu0 }
 0x156   :  { %v367_v21 = vadd.f32 %v1032_v19, %v1415_v41  ;;  %v361_v22 = vpop.f32.mrb[15].mxu0 }
 0x157   :  { %v362_v23 = vadd.f32 %v1415_v41, %v361_v22  ;;  %1079 = vmatprep.mubr.msk.f32.mxu1 %vm491_vm1, %v462_v18 }
 0x158   :  { %1080 = vmatmul.mubr.msk.f32.gmra.mrb[12].mxu1 %vm491_vm1, %v463_v20  ;;  %v465_v26 = vmax.f32 %v367_v21, 0.0 }
 0x159   :  { %v464_v24 = vmax.f32 %v362_v23, 0.0  ;;  %v1035_v25 = vpop.f32.mrb[16].mxu0 }
 0x15a   :  { %v377_v27 = vadd.f32 %v1035_v25, %v1415_v41  ;;  %v371_v28 = vpop.f32.mrb[17].mxu0 }
 0x15b   :  { %v372_v29 = vadd.f32 %v1415_v41, %v371_v28  ;;  %1082 = vmatprep.mubr.msk.f32.mxu1 %vm491_vm1, %v464_v24 }
 0x15c   :  { %1083 = vmatmul.mubr.msk.f32.gmra.mrb[14].mxu1 %vm491_vm1, %v465_v26  ;;  %v467_v32 = vmax.f32 %v377_v27, 0.0 }
 0x15d   :  { %v466_v30 = vmax.f32 %v372_v29, 0.0  ;;  %v1038_v31 = vpop.f32.mrb[18].mxu0 }
 0x15e   :  { %v387_v33 = vadd.f32 %v1038_v31, %v1415_v41  ;;  %v381_v34 = vpop.f32.mrb[19].mxu0 }
 0x15f   :  { %v382_v35 = vadd.f32 %v1415_v41, %v381_v34  ;;  %1085 = vmatprep.mubr.msk.f32.mxu1 %vm491_vm1, %v466_v30 }
 0x160   :  { %1086 = vmatmul.mubr.msk.f32.gmra.mrb[16].mxu1 %vm491_vm1, %v467_v32  ;;  %v469_v38 = vmax.f32 %v387_v33, 0.0 }
 0x161   :  { %v468_v36 = vmax.f32 %v382_v35, 0.0  ;;  %v1041_v37 = vpop.f32.mrb[20].mxu0 }
 0x162   :  { %v397_v39 = vadd.f32 %v1041_v37, %v1415_v41  ;;  %v391_v40 = vpop.f32.mrb[21].mxu0 }
 0x163   :  { %v392_v42 = vadd.f32 %v1415_v41, %v391_v40  ;;  %1088 = vmatprep.mubr.msk.f32.mxu1 %vm491_vm1, %v468_v36 }
 0x164   :  { %1089 = vmatmul.mubr.msk.f32.gmra.mrb[18].mxu1 %vm491_vm1, %v469_v38  ;;  %v471_v45 = vmax.f32 %v397_v39, 0.0 }
 0x165   :  { %v470_v43 = vmax.f32 %v392_v42, 0.0  ;;  %v1044_v44 = vpop.f32.mrb[22].mxu0 }
 0x166   :  { %v407_v46 = vadd.f32 %v1044_v44, %v1415_v41  ;;  %v401_v47 = vpop.f32.mrb[23].mxu0 }
 0x167   :  { %v402_v48 = vadd.f32 %v1415_v41, %v401_v47  ;;  %1091 = vmatprep.mubr.msk.f32.mxu1 %vm491_vm1, %v470_v43 }
 0x168   :  { %1092 = vmatmul.mubr.msk.f32.gmra.mrb[20].mxu1 %vm491_vm1, %v471_v45  ;;  %v473_v51 = vmax.f32 %v407_v46, 0.0 }
 0x169   :  { %v472_v49 = vmax.f32 %v402_v48, 0.0  ;;  %v1047_v50 = vpop.f32.mrb[24].mxu0 }
 0x16a   :  { %v417_v52 = vadd.f32 %v1047_v50, %v1415_v41  ;;  %v411_v53 = vpop.f32.mrb[25].mxu0 }
 0x16b   :  { %v412_v54 = vadd.f32 %v1415_v41, %v411_v53  ;;  %1094 = vmatprep.mubr.msk.f32.mxu1 %vm491_vm1, %v472_v49 }
 0x16c   :  { %1095 = vmatmul.mubr.msk.f32.gmra.mrb[22].mxu1 %vm491_vm1, %v473_v51  ;;  %v475_v57 = vmax.f32 %v417_v52, 0.0 }
 0x16d   :  { %v474_v55 = vmax.f32 %v412_v54, 0.0  ;;  %v1050_v56 = vpop.f32.mrb[26].mxu0 }
 0x16e   :  { %v427_v58 = vadd.f32 %v1050_v56, %v1415_v41  ;;  %v421_v59 = vpop.f32.mrb[27].mxu0 }
 0x16f   :  { %v422_v60 = vadd.f32 %v1415_v41, %v421_v59  ;;  %1097 = vmatprep.mubr.msk.f32.mxu1 %vm491_vm1, %v474_v55 }
 0x170   :  { %1098 = vmatmul.mubr.msk.f32.gmra.mrb[24].mxu1 %vm491_vm1, %v475_v57  ;;  %v477_v63 = vmax.f32 %v427_v58, 0.0 }
 0x171   :  { %v476_v61 = vmax.f32 %v422_v60, 0.0  ;;  %v1053_v62 = vpop.f32.mrb[28].mxu0 }
 0x172   :  { %v437_v0 = vadd.f32 %v1053_v62, %v1415_v41  ;;  %v431_v1 = vpop.f32.mrb[29].mxu0 }
 0x173   :  { %v432_v2 = vadd.f32 %v1415_v41, %v431_v1  ;;  %1100 = vmatprep.mubr.msk.f32.mxu1 %vm491_vm1, %v476_v61 }
 0x174   :  { %1101 = vmatmul.mubr.msk.f32.gmra.mrb[26].mxu1 %vm491_vm1, %v477_v63  ;;  %v479_v5 = vmax.f32 %v437_v0, 0.0 }
 0x175   :  { %v478_v3 = vmax.f32 %v432_v2, 0.0  ;;  %v1056_v4 = vpop.f32.mrb[30].mxu0 }
 0x176   :  { %v447_v6 = vadd.f32 %v1056_v4, %v1415_v41  ;;  %v441_v7 = vpop.f32.mrb[31].mxu0 }
 0x177   :  { %v442_v8 = vadd.f32 %v1415_v41, %v441_v7  ;;  %1103 = vmatprep.mubr.msk.f32.mxu1 %vm491_vm1, %v478_v3 }
 0x178   :  { %1104 = vmatmul.mubr.msk.f32.gmra.mrb[28].mxu1 %vm491_vm1, %v479_v5  ;;  %v481_v10 = vmax.f32 %v447_v6, 0.0 }
 0x179   :  { %v480_v9 = vmax.f32 %v442_v8, 0.0 }
 0x17b   :  { %1106 = vmatprep.mubr.msk.f32.mxu1 %vm491_vm1, %v480_v9 }
 0x17c   :  { %1107 = vmatmul.mubr.msk.f32.gmra.mrb[30].mxu1 %vm491_vm1, %v481_v10 }
 0x213   :  { %v1063_v12 = vpop.f32.mrb[0].mxu1 }
 0x214   :  { %v660_v13 = vadd.f32 %v1063_v12, %v1481_v11  ;;  %v654_v14 = vpop.f32.mrb[1].mxu1 }
 0x215   :  { %v655_v15 = vadd.f32 %v1481_v11, %v654_v14 }
 0x216   :  { %815 = vst.msk [vmem:[#allocation11 + $0x8] sm:$0xff] %vm813_vm2, %v660_v13 }
 0x217   :  { %814 = vst.msk [vmem:[#allocation11] sm:$0xff] %vm813_vm2, %v655_v15  ;;  %v1066_v41 = vpop.f32.mrb[2].mxu1 }
 0x218   :  { %v670_v16 = vadd.f32 %v1066_v41, %v1481_v11  ;;  %v664_v17 = vpop.f32.mrb[3].mxu1 }
 0x219   :  { %v665_v18 = vadd.f32 %v1481_v11, %v664_v17 }
 0x21a   :  { %817 = vst.msk [vmem:[#allocation11 + $0x18] sm:$0xff] %vm813_vm2, %v670_v16 }
 0x21b   :  { %816 = vst.msk [vmem:[#allocation11 + $0x10] sm:$0xff] %vm813_vm2, %v665_v18  ;;  %v1069_v19 = vpop.f32.mrb[4].mxu1 }
 0x21c   :  { %v680_v20 = vadd.f32 %v1069_v19, %v1481_v11  ;;  %v674_v21 = vpop.f32.mrb[5].mxu1 }
 0x21d   :  { %v675_v22 = vadd.f32 %v1481_v11, %v674_v21 }
 0x21e   :  { %819 = vst.msk [vmem:[#allocation11 + $0x28] sm:$0xff] %vm813_vm2, %v680_v20 }
 0x21f   :  { %818 = vst.msk [vmem:[#allocation11 + $0x20] sm:$0xff] %vm813_vm2, %v675_v22  ;;  %v1072_v23 = vpop.f32.mrb[6].mxu1 }
 0x220   :  { %v690_v24 = vadd.f32 %v1072_v23, %v1481_v11  ;;  %v684_v25 = vpop.f32.mrb[7].mxu1 }
 0x221   :  { %v685_v26 = vadd.f32 %v1481_v11, %v684_v25 }
 0x222   :  { %821 = vst.msk [vmem:[#allocation11 + $0x38] sm:$0xff] %vm813_vm2, %v690_v24 }
 0x223   :  { %820 = vst.msk [vmem:[#allocation11 + $0x30] sm:$0xff] %vm813_vm2, %v685_v26  ;;  %v1075_v27 = vpop.f32.mrb[8].mxu1 }
 0x224   :  { %v700_v28 = vadd.f32 %v1075_v27, %v1481_v11  ;;  %v694_v29 = vpop.f32.mrb[9].mxu1 }
 0x225   :  { %v695_v30 = vadd.f32 %v1481_v11, %v694_v29 }
 0x226   :  { %823 = vst.msk [vmem:[#allocation11 + $0x48] sm:$0xff] %vm813_vm2, %v700_v28 }
 0x227   :  { %822 = vst.msk [vmem:[#allocation11 + $0x40] sm:$0xff] %vm813_vm2, %v695_v30  ;;  %v1078_v31 = vpop.f32.mrb[10].mxu1 }
 0x228   :  { %v710_v32 = vadd.f32 %v1078_v31, %v1481_v11  ;;  %v704_v33 = vpop.f32.mrb[11].mxu1 }
 0x229   :  { %v705_v34 = vadd.f32 %v1481_v11, %v704_v33 }
 0x22a   :  { %825 = vst.msk [vmem:[#allocation11 + $0x58] sm:$0xff] %vm813_vm2, %v710_v32 }
 0x22b   :  { %824 = vst.msk [vmem:[#allocation11 + $0x50] sm:$0xff] %vm813_vm2, %v705_v34  ;;  %v1081_v35 = vpop.f32.mrb[12].mxu1 }
 0x22c   :  { %v720_v36 = vadd.f32 %v1081_v35, %v1481_v11  ;;  %v714_v37 = vpop.f32.mrb[13].mxu1 }
 0x22d   :  { %v715_v38 = vadd.f32 %v1481_v11, %v714_v37 }
 0x22e   :  { %827 = vst.msk [vmem:[#allocation11 + $0x68] sm:$0xff] %vm813_vm2, %v720_v36 }
 0x22f   :  { %826 = vst.msk [vmem:[#allocation11 + $0x60] sm:$0xff] %vm813_vm2, %v715_v38  ;;  %v1084_v39 = vpop.f32.mrb[14].mxu1 }
 0x230   :  { %v730_v40 = vadd.f32 %v1084_v39, %v1481_v11  ;;  %v724_v42 = vpop.f32.mrb[15].mxu1 }
 0x231   :  { %v725_v43 = vadd.f32 %v1481_v11, %v724_v42 }
 0x232   :  { %829 = vst.msk [vmem:[#allocation11 + $0x78] sm:$0xff] %vm813_vm2, %v730_v40 }
 0x233   :  { %828 = vst.msk [vmem:[#allocation11 + $0x70] sm:$0xff] %vm813_vm2, %v725_v43  ;;  %v1087_v44 = vpop.f32.mrb[16].mxu1 }
 0x234   :  { %v740_v45 = vadd.f32 %v1087_v44, %v1481_v11  ;;  %v734_v46 = vpop.f32.mrb[17].mxu1 }
 0x235   :  { %v735_v47 = vadd.f32 %v1481_v11, %v734_v46 }
 0x236   :  { %831 = vst.msk [vmem:[#allocation11 + $0x88] sm:$0xff] %vm813_vm2, %v740_v45 }
 0x237   :  { %830 = vst.msk [vmem:[#allocation11 + $0x80] sm:$0xff] %vm813_vm2, %v735_v47  ;;  %v1090_v48 = vpop.f32.mrb[18].mxu1 }
 0x238   :  { %v750_v49 = vadd.f32 %v1090_v48, %v1481_v11  ;;  %v744_v50 = vpop.f32.mrb[19].mxu1 }
 0x239   :  { %v745_v51 = vadd.f32 %v1481_v11, %v744_v50 }
 0x23a   :  { %833 = vst.msk [vmem:[#allocation11 + $0x98] sm:$0xff] %vm813_vm2, %v750_v49 }
 0x23b   :  { %832 = vst.msk [vmem:[#allocation11 + $0x90] sm:$0xff] %vm813_vm2, %v745_v51  ;;  %v1093_v52 = vpop.f32.mrb[20].mxu1 }
 0x23c   :  { %v760_v53 = vadd.f32 %v1093_v52, %v1481_v11  ;;  %v754_v54 = vpop.f32.mrb[21].mxu1 }
 0x23d   :  { %v755_v55 = vadd.f32 %v1481_v11, %v754_v54 }
 0x23e   :  { %835 = vst.msk [vmem:[#allocation11 + $0xa8] sm:$0xff] %vm813_vm2, %v760_v53 }
 0x23f   :  { %834 = vst.msk [vmem:[#allocation11 + $0xa0] sm:$0xff] %vm813_vm2, %v755_v55  ;;  %v1096_v56 = vpop.f32.mrb[22].mxu1 }
 0x240   :  { %v770_v57 = vadd.f32 %v1096_v56, %v1481_v11  ;;  %v764_v58 = vpop.f32.mrb[23].mxu1 }
 0x241   :  { %v765_v59 = vadd.f32 %v1481_v11, %v764_v58 }
 0x242   :  { %837 = vst.msk [vmem:[#allocation11 + $0xb8] sm:$0xff] %vm813_vm2, %v770_v57 }
 0x243   :  { %836 = vst.msk [vmem:[#allocation11 + $0xb0] sm:$0xff] %vm813_vm2, %v765_v59  ;;  %v1099_v60 = vpop.f32.mrb[24].mxu1 }
 0x244   :  { %v780_v61 = vadd.f32 %v1099_v60, %v1481_v11  ;;  %v774_v62 = vpop.f32.mrb[25].mxu1 }
 0x245   :  { %v775_v63 = vadd.f32 %v1481_v11, %v774_v62 }
 0x246   :  { %839 = vst.msk [vmem:[#allocation11 + $0xc8] sm:$0xff] %vm813_vm2, %v780_v61 }
 0x247   :  { %838 = vst.msk [vmem:[#allocation11 + $0xc0] sm:$0xff] %vm813_vm2, %v775_v63  ;;  %v1102_v0 = vpop.f32.mrb[26].mxu1 }
 0x248   :  { %v790_v1 = vadd.f32 %v1102_v0, %v1481_v11  ;;  %v784_v2 = vpop.f32.mrb[27].mxu1 }
 0x249   :  { %v785_v3 = vadd.f32 %v1481_v11, %v784_v2 }
 0x24a   :  { %841 = vst.msk [vmem:[#allocation11 + $0xd8] sm:$0xff] %vm813_vm2, %v790_v1 }
 0x24b   :  { %840 = vst.msk [vmem:[#allocation11 + $0xd0] sm:$0xff] %vm813_vm2, %v785_v3  ;;  %v1105_v4 = vpop.f32.mrb[28].mxu1 }
 0x24c   :  { %v800_v5 = vadd.f32 %v1105_v4, %v1481_v11  ;;  %v794_v6 = vpop.f32.mrb[29].mxu1 }
 0x24d   :  { %v795_v7 = vadd.f32 %v1481_v11, %v794_v6 }
 0x24e   :  { %843 = vst.msk [vmem:[#allocation11 + $0xe8] sm:$0xff] %vm813_vm2, %v800_v5 }
 0x24f   :  { %842 = vst.msk [vmem:[#allocation11 + $0xe0] sm:$0xff] %vm813_vm2, %v795_v7  ;;  %v1108_v8 = vpop.f32.mrb[30].mxu1 }
 0x250   :  { %v810_v9 = vadd.f32 %v1108_v8, %v1481_v11  ;;  %v804_v10 = vpop.f32.mrb[31].mxu1 }
 0x251   :  { %v805_v12 = vadd.f32 %v1481_v11, %v804_v10 }
 0x252   :  { %845 = vst.msk [vmem:[#allocation11 + $0xf8] sm:$0xff] %vm813_vm2, %v810_v9 }
 0x253   :  { %844 = vst.msk [vmem:[#allocation11 + $0xf0] sm:$0xff] %vm813_vm2, %v805_v12 }
 0x254   :  { %1250 = shalt.err (!%p1247_p2)
}
 0x255   :  { %s1251_s9 = scalar_lea.hbm %s1567_s5, 4096 }
 0x256   :  { %p1252_p3 = scmp.ne.s32.totalorder %s1567_s5, %s1251_s9  ;;  %p1255_p4 = scmp.lt.u32.totalorder %s1251_s9, %s1567_s5 }
 0x258   :  { %p1257_p5 = pnand %p1255_p4, %p1252_p3 }
 0x25a   :  { %1260 = shalt.err (!%p1257_p5)
}
 0x25b   :  { %857 = dma.vmem_to_hbm [thread:$0]  %s852_s3, 4096, %s1567_s5, [#allocation4], %s1271_s30, %s1271_s30, %s1272_s6  }
 0x25c   :  { %1267 = dma.done.wait [#allocation4], 4096  }
 0x25d   :  { %1268 = vsyncadd [#allocation4], 4294963200 }
 0x25e   :  { %861 = vsyncpa [#allocation3], 1 }
 0x25f   :  { %862 = vsyncpa [#allocation6], 1 }
 0x260   :  { %863 = vsyncpa [#allocation9], 1 }
 0x261   :  { %864 = vsyncpa [#allocation4], 1 }

</bundles_post_ra>
